<compile_context>
chip_gen: v5e
topology: v5e:2x2
jax: 0.10.0
libtpu: 0.0.40
codegen_flags: <defaults>
</compile_context>

<pallas_src>
import functools

import jax
import jax.numpy as jnp
from jax import lax
from jax.experimental import pallas as pl
from jax.experimental.pallas import tpu as pltpu

BN_EPS = 1e-5
LANE = 128


def _round_up(x, mult):
    return (x + mult - 1) // mult * mult


def _vmem_budget():
    """(vmem_limit_bytes, big_vmem) derived from the local TPU generation."""
    cap = None
    try:
        cap = int(pltpu.get_tpu_info().vmem_capacity_bytes)
    except Exception:
        try:
            kind = jax.devices()[0].device_kind.lower()
            cap = 64 * 1024 * 1024 if "7" in kind else 128 * 1024 * 1024
        except Exception:
            cap = 64 * 1024 * 1024
    if cap >= 100 * 1024 * 1024:
        return 100 * 1024 * 1024, True     # v5e / v6e: 128 MiB physical
    return 48 * 1024 * 1024, False          # v7x: 64 MiB physical, leave headroom


_VMEM_LIMIT, _BIG_VMEM = _vmem_budget()


def _c_tile(c_out):
    """Output-channel tile: 256 on the 2x256 MXUs (v6e/v7x), 128 on v5e."""
    if c_out <= LANE:
        return LANE
    try:
        kind = jax.devices()[0].device_kind.lower()
    except Exception:
        kind = ""
    if "v5" in kind:        # v5e MXU is 4x128x128 -> 128-wide tiles are native
        return LANE
    return 256


# ----------------------------------------------------------------------------
# Phase 1: acc = patches @ W (bf16 MXU, f32 accumulation over K blocks);
#          at the last K block write y = acc + bias (bf16) and this M block's
#          partial per-channel sum / sum-of-squares of the *bias-free* acc.
# ----------------------------------------------------------------------------
def _conv_stats_kernel(xp_ref, w_ref, b_ref, y_ref, stats_ref, acc_ref, *,
                       tm, m_true, need_mask):
    kb = pl.program_id(2)

    @pl.when(kb == 0)
    def _():
        acc_ref[...] = jnp.zeros_like(acc_ref)

    acc_ref[...] += jnp.dot(xp_ref[...], w_ref[...],
                            preferred_element_type=jnp.float32)

    @pl.when(kb == pl.num_programs(2) - 1)
    def _():
        acc = acc_ref[...]
        y_ref[...] = (acc + b_ref[...]).astype(y_ref.dtype)
        # Exclude zero-padded rows from the BN statistics (division by the
        # true M happens in the wrapper).
        if need_mask:
            mb = pl.program_id(0)
            rows = mb * tm + lax.broadcasted_iota(jnp.int32, (tm, 1), 0)
            acc = jnp.where(rows < m_true, acc, 0.0)
        s1 = jnp.sum(acc, axis=0, keepdims=True)
        s2 = jnp.sum(acc * acc, axis=0, keepdims=True)
        stats_ref[...] = jnp.concatenate([s1, s2], axis=0).reshape(
            1, 2, s1.shape[-1])


# ----------------------------------------------------------------------------
# Phase 2: out^T = (y * scale + shift)^T   (per-channel affine + XLU transpose)
# ----------------------------------------------------------------------------
def _bn_apply_kernel(y_ref, scale_ref, shift_ref, o_ref):
    y = y_ref[...].astype(jnp.float32)
    out = y * scale_ref[...] + shift_ref[...]
    o_ref[...] = out.T.astype(o_ref.dtype)


# ----------------------------------------------------------------------------
# im2col (pure JAX, bf16, fused under jit)
# ----------------------------------------------------------------------------
def _im2col(x, kh, kw, stride, padding):
    """x: (N, C, H, W) -> patches (N*H_out*W_out, C*kh*kw), K order = (c, i, j)."""
    n, c, h, w = x.shape
    xp = jnp.pad(x, ((0, 0), (0, 0), (padding, padding), (padding, padding)))
    h_out = (h + 2 * padding - kh) // stride + 1
    w_out = (w + 2 * padding - kw) // stride + 1
    cols = []
    for i in range(kh):
        for j in range(kw):
            cols.append(xp[:, :, i:i + stride * h_out:stride, j:j + stride * w_out:stride])
    cols = jnp.stack(cols, axis=0).reshape(kh, kw, n, c, h_out, w_out)
    # -> (N, H_out, W_out, C, kh, kw) -> (M, K); K ordering matches PyTorch
    # weight.reshape(C_out, C_in*kh*kw).
    cols = cols.transpose(2, 4, 5, 3, 0, 1).reshape(n * h_out * w_out, c * kh * kw)
    return cols, h_out, w_out


@functools.partial(jax.jit, static_argnames=("stride", "padding"))
def convreg_forward(x, weight, bias, gamma, beta, *, stride, padding):
    """ConvReg(use_relu=False) forward: Conv2d -> BatchNorm2d (train stats)."""
    n, c_in, _, _ = x.shape
    c_out, _, kh, kw = weight.shape

    # im2col directly in bf16 (half the XLA-side traffic), single bf16 pad.
    patches, h_out, w_out = _im2col(x.astype(jnp.bfloat16), kh, kw, stride, padding)
    m, k = patches.shape

    tile_c = _c_tile(c_out)
    c_pad = _round_up(c_out, tile_c)
    n_cb = c_pad // tile_c

    # M / K tiles: MXU-sized M tiles regardless of K (K is a grid reduction
    # axis), lane-dense (multiples of 128) everywhere.
    tm_max = 1024 if _BIG_VMEM else 512
    tk_max = 2048 if _BIG_VMEM else 1024
    tm = min(tm_max, _round_up(m, 128))
    m_pad = _round_up(m, tm)
    n_mb = m_pad // tm
    tk = min(tk_max, _round_up(k, 128))
    k_pad = _round_up(k, tk)
    n_kb = k_pad // tk
    # NOTE: when n_kb > 1 *and* n_cb > 1 the patches slab is re-read once per
    # C block (reduction axis must stay innermost); rare for connector shapes.

    patches_p = jnp.pad(patches, ((0, m_pad - m), (0, k_pad - k)))
    w_mat = weight.reshape(c_out, c_in * kh * kw).T.astype(jnp.bfloat16)
    w_p = jnp.pad(w_mat, ((0, k_pad - k), (0, c_pad - c_out)))
    b_p = jnp.pad(bias.astype(jnp.float32), (0, c_pad - c_out)).reshape(1, c_pad)
    g_p = jnp.pad(gamma.astype(jnp.float32), (0, c_pad - c_out)).reshape(1, c_pad)
    be_p = jnp.pad(beta.astype(jnp.float32), (0, c_pad - c_out)).reshape(1, c_pad)

    kern1 = functools.partial(_conv_stats_kernel, tm=tm, m_true=m,
                              need_mask=(m_pad != m))
    y_pad, stats_part = pl.pallas_call(
        kern1,
        out_shape=(jax.ShapeDtypeStruct((m_pad, c_pad), jnp.bfloat16),
                   jax.ShapeDtypeStruct((n_mb, 2, c_pad), jnp.float32)),
        grid_spec=pltpu.PrefetchScalarGridSpec(
            num_scalar_prefetch=0,
            grid=(n_mb, n_cb, n_kb),
            in_specs=[
                pl.BlockSpec((tm, tk), lambda mb, cb, kb: (mb, kb)),       # patches
                pl.BlockSpec((tk, tile_c), lambda mb, cb, kb: (kb, cb)),   # weight
                pl.BlockSpec((1, tile_c), lambda mb, cb, kb: (0, cb)),     # bias
            ],
            out_specs=(
                pl.BlockSpec((tm, tile_c), lambda mb, cb, kb: (mb, cb)),   # y (bf16)
                pl.BlockSpec((1, 2, tile_c), lambda mb, cb, kb: (mb, 0, cb)),  # stats
            ),
            scratch_shapes=[pltpu.VMEM((tm, tile_c), jnp.float32)],
        ),
        compiler_params=pltpu.CompilerParams(
            dimension_semantics=("parallel", "parallel", "arbitrary"),
            vmem_limit_bytes=_VMEM_LIMIT),
    )(patches_p, w_p, b_p)

    # Finalize BatchNorm on the tiny (n_mb, 2, C) partial stats.  Stats were
    # accumulated on the bias-free conv output, so the one-pass variance is
    # immune to a large bias shift; mean is recovered by adding the bias back.
    stats = jnp.sum(stats_part, axis=0)                      # (2, c_pad)
    mean0 = stats[0:1, :] / m
    var = jnp.maximum(stats[1:2, :] / m - mean0 * mean0, 0.0)
    mean = mean0 + b_p
    inv = lax.rsqrt(var + BN_EPS)
    scale = g_p * inv
    shift = be_p - mean * scale

    # Phase 2: collapse the C axis when it fits one block (<= 512 lanes).
    c_blk = c_pad if c_pad <= 512 else tile_c
    n_cb2 = c_pad // c_blk
    # Final output kept f32 (matches the PyTorch module's dtype); switch the
    # out_shape dtype to bf16 if downstream can consume it to halve this write.
    out_pad = pl.pallas_call(
        _bn_apply_kernel,
        out_shape=jax.ShapeDtypeStruct((c_pad, m_pad), jnp.float32),
        grid_spec=pltpu.PrefetchScalarGridSpec(
            num_scalar_prefetch=0,
            grid=(n_mb, n_cb2),
            in_specs=[
                pl.BlockSpec((tm, c_blk), lambda mb, cb: (mb, cb)),
                pl.BlockSpec((1, c_blk), lambda mb, cb: (0, cb)),
                pl.BlockSpec((1, c_blk), lambda mb, cb: (0, cb)),
            ],
            out_specs=pl.BlockSpec((c_blk, tm), lambda mb, cb: (cb, mb)),
        ),
        compiler_params=pltpu.CompilerParams(
            dimension_semantics=("parallel", "parallel"),
            vmem_limit_bytes=_VMEM_LIMIT),
    )(y_pad, scale, shift)

    # (c, n*h*w) -> (n, c, h, w): only a cheap major-dim (c, n) swap over
    # contiguous H*W rows remains (the minor-dim transpose happened in-kernel).
    return (out_pad[:c_out, :m]
            .reshape(c_out, n, h_out, w_out)
            .transpose(1, 0, 2, 3))


# ----------------------------------------------------------------------------
# Connector: build per-feature connectors from (s_shapes, t_shapes)
# ----------------------------------------------------------------------------
class ConnectorPallas:
    def __init__(self, s_shapes, t_shapes, key):
        assert len(s_shapes) == len(t_shapes), "unequal length of feat list"
        self.specs = []   # list of None (identity) or param dicts
        for s, t in zip(s_shapes, t_shapes):
            s_n, s_c, s_h, s_w = s
            t_n, t_c, t_h, t_w = t
            if s_c == t_c and s_h == t_h:
                self.specs.append(None)
                continue
            if s_h == 2 * t_h:
                kh, kw, stride, padding = 3, 3, 2, 1
            elif s_h * 2 == t_h:
                # TODO(synk): ConvTranspose2d(k=4, s=2, p=1) path not implemented in Pallas.
                raise NotImplementedError("ConvTranspose2d connector not implemented")
            elif s_h >= t_h:
                kh, kw, stride, padding = 1 + s_h - t_h, 1 + s_w - t_w, 1, 0
            else:
                raise NotImplementedError(f"student size {s_h}, teacher size {t_h}")

            key, wk, bk = jax.random.split(key, 3)
            fan_in = s_c * kh * kw
            bound = 1.0 / float(jnp.sqrt(fan_in))
            weight = jax.random.uniform(wk, (t_c, s_c, kh, kw), jnp.float32, -bound, bound)
            bias = jax.random.uniform(bk, (t_c,), jnp.float32, -bound, bound)
            gamma = jnp.ones((t_c,), jnp.float32)    # BatchNorm2d defaults
            beta = jnp.zeros((t_c,), jnp.float32)
            self.specs.append(dict(weight=weight, bias=bias, gamma=gamma, beta=beta,
                                   stride=stride, padding=padding))

    def __call__(self, g_s):
        out = []
        for x, spec in zip(g_s, self.specs):
            if spec is None:
                out.append(x)   # nn.Sequential() == identity
            else:
                out.append(convreg_forward(x, spec["weight"], spec["bias"],
                                           spec["gamma"], spec["beta"],
                                           stride=spec["stride"],
                                           padding=spec["padding"]))
        return out


# ----------------------------------------------------------------------------
# Pure-JAX reference (for correctness check only)
# ----------------------------------------------------------------------------
def _convreg_ref(x, weight, bias, gamma, beta, stride, padding):
    y = lax.conv_general_dilated(
        x, weight, window_strides=(stride, stride),
        padding=[(padding, padding), (padding, padding)],
        dimension_numbers=("NCHW", "OIHW", "NCHW"))
    y = y + bias[None, :, None, None]
    mean = jnp.mean(y, axis=(0, 2, 3), keepdims=True)
    var = jnp.mean((y - mean) ** 2, axis=(0, 2, 3), keepdims=True)
    return gamma[None, :, None, None] * (y - mean) * lax.rsqrt(var + BN_EPS) \
        + beta[None, :, None, None]


if __name__ == "__main__":
    key = jax.random.PRNGKey(0)
    key, k0, k1, k2, kc = jax.random.split(key, 5)

    # Student / teacher feature shapes covering all implemented connector cases:
    #   [0] identity (same C, same H)
    #   [1] 1x1 conv + BN (same H, different C)
    #   [2] 3x3 stride-2 pad-1 conv + BN (s_H == 2*t_H)
    s_shapes = [(2, 8, 8, 8), (2, 4, 8, 8), (2, 4, 16, 16)]
    t_shapes = [(2, 8, 8, 8), (2, 8, 8, 8), (2, 8, 8, 8)]

    g_s = [
        jax.random.normal(k0, s_shapes[0], jnp.float32),
        jax.random.normal(k1, s_shapes[1], jnp.float32),
        jax.random.normal(k2, s_shapes[2], jnp.float32),
    ]

    connector = ConnectorPallas(s_shapes, t_shapes, kc)
    out = connector(g_s)
    out = [jax.block_until_ready(o) for o in out]

    # Shape checks + numerical check against a pure-JAX f32 reference
    # (bf16 matmul operands / bf16 y intermediate with f32 accumulation and
    # f32 BN statistics -> looser tolerance).
    for o, t in zip(out, t_shapes):
        assert o.shape == t, (o.shape, t)
    assert jnp.allclose(out[0], g_s[0])
    for i in (1, 2):
        spec = connector.specs[i]
        ref = _convreg_ref(g_s[i], spec["weight"], spec["bias"], spec["gamma"],
                           spec["beta"], spec["stride"], spec["padding"])
        assert jnp.allclose(out[i], ref, atol=3e-2, rtol=3e-2), \
            float(jnp.max(jnp.abs(out[i] - ref)))

    print("KERNEL_OK")
</pallas_src>

<mosaic_0001>
module attributes {stable_mosaic.version = 11 : i64} {
  func.func @_conv_stats_kernel(%arg0: i32, %arg1: i32, %arg2: i32, %arg3: memref<128x128xbf16, #tpu.memory_space<vmem>>, %arg4: memref<128x128xbf16, #tpu.memory_space<vmem>>, %arg5: memref<1x128xf32, #tpu.memory_space<vmem>>, %arg6: memref<128x128xbf16, #tpu.memory_space<vmem>>, %arg7: memref<1x2x128xf32, #tpu.memory_space<vmem>>, %arg8: memref<128x128xf32, #tpu.memory_space<vmem>>) attributes {dimension_semantics = [#tpu.dimension_semantics<parallel>, #tpu.dimension_semantics<parallel>, #tpu.dimension_semantics<arbitrary>], iteration_bounds = array<i64: 1, 1, 1>, scalar_prefetch = 0 : i64, scratch_operands = 1 : i64, tpu.core_type = #tpu.core_type<tc>, window_params = [{transform_indices = @transform_0, window_bounds = array<i64: 128, 128>}, {transform_indices = @transform_1, window_bounds = array<i64: 128, 128>}, {transform_indices = @transform_2, window_bounds = array<i64: 1, 128>}, {transform_indices = @transform_3, window_bounds = array<i64: 128, 128>}, {transform_indices = @transform_4, window_bounds = array<i64: 1, 2, 128>}]} {
    %c0_i32 = arith.constant 0 : i32
    %0 = arith.cmpi eq, %arg2, %c0_i32 : i32
    %1 = arith.extui %0 : i1 to i32
    %c0_i32_0 = arith.constant 0 : i32
    %2 = arith.cmpi ne, %1, %c0_i32_0 : i32
    scf.if %2 {
      %cst_10 = arith.constant 0.000000e+00 : f32
      %12 = vector.broadcast %cst_10 : f32 to vector<128x128xf32>
      %c0_11 = arith.constant 0 : index
      %c0_12 = arith.constant 0 : index
      %13 = vector.load %arg8[%c0_11, %c0_12] : memref<128x128xf32, #tpu.memory_space<vmem>>, vector<128x128xf32>
      tpu.vector_store %arg8[%c0_11, %c0_12], %12 {strides = array<i32>} : memref<128x128xf32, #tpu.memory_space<vmem>>, vector<128x128xf32>,
    } else {
    }
    %c0 = arith.constant 0 : index
    %c0_1 = arith.constant 0 : index
    %3 = vector.load %arg8[%c0, %c0_1] : memref<128x128xf32, #tpu.memory_space<vmem>>, vector<128x128xf32>
    %c0_2 = arith.constant 0 : index
    %c0_3 = arith.constant 0 : index
    %4 = vector.load %arg3[%c0_2, %c0_3] : memref<128x128xbf16, #tpu.memory_space<vmem>>, vector<128x128xbf16>
    %c0_4 = arith.constant 0 : index
    %c0_5 = arith.constant 0 : index
    %5 = vector.load %arg4[%c0_4, %c0_5] : memref<128x128xbf16, #tpu.memory_space<vmem>>, vector<128x128xbf16>
    %cst = arith.constant dense<0.000000e+00> : vector<128x128xf32>
    %6 = tpu.matmul %4, %5, %cst {dimension_numbers = #tpu.dot_dimension_numbers<[1], [0], [0], [1], [0, 0, 1, 1], [], []>} : vector<128x128xbf16>, vector<128x128xbf16>, vector<128x128xf32> -> vector<128x128xf32>
    %7 = arith.addf %3, %6 : vector<128x128xf32>
    %c0_6 = arith.constant 0 : index
    %c0_7 = arith.constant 0 : index
    %8 = vector.load %arg8[%c0_6, %c0_7] : memref<128x128xf32, #tpu.memory_space<vmem>>, vector<128x128xf32>
    tpu.vector_store %arg8[%c0_6, %c0_7], %7 {strides = array<i32>} : memref<128x128xf32, #tpu.memory_space<vmem>>, vector<128x128xf32>,
    %c0_i32_8 = arith.constant 0 : i32
    %9 = arith.cmpi eq, %arg2, %c0_i32_8 : i32
    %10 = arith.extui %9 : i1 to i32
    %c0_i32_9 = arith.constant 0 : i32
    %11 = arith.cmpi ne, %10, %c0_i32_9 : i32
    scf.if %11 {
      %c0_10 = arith.constant 0 : index
      %c0_11 = arith.constant 0 : index
      %12 = vector.load %arg8[%c0_10, %c0_11] : memref<128x128xf32, #tpu.memory_space<vmem>>, vector<128x128xf32>
      %c0_12 = arith.constant 0 : index
      %c0_13 = arith.constant 0 : index
      %13 = vector.load %arg5[%c0_12, %c0_13] : memref<1x128xf32, #tpu.memory_space<vmem>>, vector<1x128xf32>
      %14 = vector.broadcast %13 : vector<1x128xf32> to vector<128x128xf32>
      %15 = arith.addf %12, %14 : vector<128x128xf32>
      %16 = arith.truncf %15 : vector<128x128xf32> to vector<128x128xbf16>
      %c0_14 = arith.constant 0 : index
      %c0_15 = arith.constant 0 : index
      %17 = vector.load %arg6[%c0_14, %c0_15] : memref<128x128xbf16, #tpu.memory_space<vmem>>, vector<128x128xbf16>
      tpu.vector_store %arg6[%c0_14, %c0_15], %16 {strides = array<i32>} : memref<128x128xbf16, #tpu.memory_space<vmem>>, vector<128x128xbf16>,
      %cst_16 = arith.constant dense<0.000000e+00> : vector<128xf32>
      %18 = vector.multi_reduction <add>, %12, %cst_16 [0] : vector<128x128xf32> to vector<128xf32>
      %19 = vector.shape_cast %18 : vector<128xf32> to vector<1x128xf32>
      %20 = arith.mulf %12, %12 : vector<128x128xf32>
      %cst_17 = arith.constant dense<0.000000e+00> : vector<128xf32>
      %21 = vector.multi_reduction <add>, %20, %cst_17 [0] : vector<128x128xf32> to vector<128xf32>
      %22 = vector.shape_cast %21 : vector<128xf32> to vector<1x128xf32>
      %23 = tpu.concatenate %19, %22 in 0 : vector<1x128xf32>, vector<1x128xf32> -> vector<2x128xf32>
      %24 = vector.shape_cast %23 : vector<2x128xf32> to vector<1x2x128xf32>
      %c0_18 = arith.constant 0 : index
      %c0_19 = arith.constant 0 : index
      %c0_20 = arith.constant 0 : index
      %25 = vector.load %arg7[%c0_18, %c0_19, %c0_20] : memref<1x2x128xf32, #tpu.memory_space<vmem>>, vector<1x2x128xf32>
      tpu.vector_store %arg7[%c0_18, %c0_19, %c0_20], %24 {strides = array<i32>} : memref<1x2x128xf32, #tpu.memory_space<vmem>>, vector<1x2x128xf32>,
    } else {
    }
    return
  }
  func.func @transform_0(%arg0: i32, %arg1: i32, %arg2: i32) -> (i32, i32) {
    %c0_i32 = arith.constant 0 : i32
    return %arg0, %arg2 : i32, i32
  }
  func.func @transform_1(%arg0: i32, %arg1: i32, %arg2: i32) -> (i32, i32) {
    %c0_i32 = arith.constant 0 : i32
    return %arg2, %arg1 : i32, i32
  }
  func.func @transform_2(%arg0: i32, %arg1: i32, %arg2: i32) -> (i32, i32) {
    %c0_i32 = arith.constant 0 : i32
    %c0_i32_0 = arith.constant 0 : i32
    return %c0_i32, %arg1 : i32, i32
  }
  func.func @transform_3(%arg0: i32, %arg1: i32, %arg2: i32) -> (i32, i32) {
    %c0_i32 = arith.constant 0 : i32
    return %arg0, %arg1 : i32, i32
  }
  func.func @transform_4(%arg0: i32, %arg1: i32, %arg2: i32) -> (i32, i32, i32) {
    %c0_i32 = arith.constant 0 : i32
    %c0_i32_0 = arith.constant 0 : i32
    return %arg0, %c0_i32, %arg1 : i32, i32, i32
  }
}

module attributes {stable_mosaic.version = 11 : i64} {
  func.func @_bn_apply_kernel(%arg0: i32, %arg1: i32, %arg2: memref<128x128xbf16, #tpu.memory_space<vmem>>, %arg3: memref<1x128xf32, #tpu.memory_space<vmem>>, %arg4: memref<1x128xf32, #tpu.memory_space<vmem>>, %arg5: memref<128x128xf32, #tpu.memory_space<vmem>>) attributes {dimension_semantics = [#tpu.dimension_semantics<parallel>, #tpu.dimension_semantics<parallel>], iteration_bounds = array<i64: 1, 1>, scalar_prefetch = 0 : i64, scratch_operands = 0 : i64, tpu.core_type = #tpu.core_type<tc>, window_params = [{transform_indices = @transform_0, window_bounds = array<i64: 128, 128>}, {transform_indices = @transform_1, window_bounds = array<i64: 1, 128>}, {transform_indices = @transform_2, window_bounds = array<i64: 1, 128>}, {transform_indices = @transform_3, window_bounds = array<i64: 128, 128>}]} {
    %c0 = arith.constant 0 : index
    %c0_0 = arith.constant 0 : index
    %0 = vector.load %arg2[%c0, %c0_0] : memref<128x128xbf16, #tpu.memory_space<vmem>>, vector<128x128xbf16>
    %1 = arith.extf %0 : vector<128x128xbf16> to vector<128x128xf32>
    %c0_1 = arith.constant 0 : index
    %c0_2 = arith.constant 0 : index
    %2 = vector.load %arg3[%c0_1, %c0_2] : memref<1x128xf32, #tpu.memory_space<vmem>>, vector<1x128xf32>
    %3 = vector.broadcast %2 : vector<1x128xf32> to vector<128x128xf32>
    %4 = arith.mulf %1, %3 : vector<128x128xf32>
    %c0_3 = arith.constant 0 : index
    %c0_4 = arith.constant 0 : index
    %5 = vector.load %arg4[%c0_3, %c0_4] : memref<1x128xf32, #tpu.memory_space<vmem>>, vector<1x128xf32>
    %6 = vector.broadcast %5 : vector<1x128xf32> to vector<128x128xf32>
    %7 = arith.addf %4, %6 : vector<128x128xf32>
    %8 = tpu.transpose %7, [1, 0] : vector<128x128xf32> -> vector<128x128xf32>
    %c0_5 = arith.constant 0 : index
    %c0_6 = arith.constant 0 : index
    %9 = vector.load %arg5[%c0_5, %c0_6] : memref<128x128xf32, #tpu.memory_space<vmem>>, vector<128x128xf32>
    tpu.vector_store %arg5[%c0_5, %c0_6], %8 {strides = array<i32>} : memref<128x128xf32, #tpu.memory_space<vmem>>, vector<128x128xf32>,
    return
  }
  func.func @transform_0(%arg0: i32, %arg1: i32) -> (i32, i32) {
    %c0_i32 = arith.constant 0 : i32
    return %arg0, %arg1 : i32, i32
  }
  func.func @transform_1(%arg0: i32, %arg1: i32) -> (i32, i32) {
    %c0_i32 = arith.constant 0 : i32
    %c0_i32_0 = arith.constant 0 : i32
    return %c0_i32, %arg1 : i32, i32
  }
  func.func @transform_2(%arg0: i32, %arg1: i32) -> (i32, i32) {
    %c0_i32 = arith.constant 0 : i32
    %c0_i32_0 = arith.constant 0 : i32
    return %c0_i32, %arg1 : i32, i32
  }
  func.func @transform_3(%arg0: i32, %arg1: i32) -> (i32, i32) {
    %c0_i32 = arith.constant 0 : i32
    return %arg1, %arg0 : i32, i32
  }
}

</mosaic_0001>

<bundles_post_ra>
// kernel: convreg_forward.3
= control target key start
LH: loop header
LB: loop body
LE: loop exit
PB: predicated region body
PF: predicated region fallthrough
CT: control target
= control target key end

     0   :  { %s313_s0 = inlined_call_operand.vmem [shape: bf16[128,128], index: 0, kind: input, shape index: {}]   ;;  %s314_s1 = inlined_call_operand.vmem [shape: f32[1,128], index: 1, kind: input, shape index: {}]   ;;  %s315_s2 = inlined_call_operand.vmem [shape: f32[1,128], index: 2, kind: input, shape index: {}]   ;;  %s316_s3 = inlined_call_operand.vmem [shape: f32[128,128], index: 3, kind: output, shape index: {}]  }
   0x1   :  { %v139_v0 = vld [vmem:[%s313_s0] sm:$0xff]   ;;  %v170_v8 = vld [vmem:[%s313_s0 + $0x8] sm:$0xff]   ;;  %v171_v15 = vld [vmem:[%s313_s0 + $0x10] sm:$0xff]  }
   0x2   :  { %v205_v1 = vld [vmem:[%s314_s1] ss:$0 sm:$0xff]  ;;  %v140_v2 = vunpack.c.l.bf16 %v139_v0  ;;  %v141_v5 = vunpack.c.h.bf16 %v139_v0  ;;  %v144_v10 = vunpack.c.l.bf16 %v170_v8  ;;  %v145_v13 = vunpack.c.h.bf16 %v170_v8  ;;  %v172_v22 = vld [vmem:[%s313_s0 + $0x18] sm:$0xff]   ;;  %v174_v36 = vld [vmem:[%s313_s0 + $0x28] sm:$0xff]  }
   0x3   :  { %v210_v3 = vld [vmem:[%s315_s2] ss:$0 sm:$0xff]  ;;  %v148_v17 = vunpack.c.l.bf16 %v171_v15  ;;  %v149_v20 = vunpack.c.h.bf16 %v171_v15  ;;  %v152_v24 = vunpack.c.l.bf16 %v172_v22  ;;  %v153_v27 = vunpack.c.h.bf16 %v172_v22  ;;  %v175_v43 = vld [vmem:[%s313_s0 + $0x30] sm:$0xff]   ;;  %v176_v50 = vld [vmem:[%s313_s0 + $0x38] sm:$0xff]  }
   0x4   :  { %v50_v4 = vmul.f32 %v205_v1, %v140_v2  ;;  %v51_v7 = vmul.f32 %v205_v1, %v141_v5  ;;  %v52_v11 = vmul.f32 %v205_v1, %v144_v10  ;;  %v53_v14 = vmul.f32 %v205_v1, %v145_v13  ;;  %v173_v29 = vld [vmem:[%s313_s0 + $0x20] sm:$0xff]  }
   0x5   :  { %v54_v18 = vmul.f32 %v205_v1, %v148_v17  ;;  %v55_v21 = vmul.f32 %v205_v1, %v149_v20  ;;  %v56_v25 = vmul.f32 %v205_v1, %v152_v24  ;;  %v57_v28 = vmul.f32 %v205_v1, %v153_v27 }
   0x6   :  { %v70_v6 = vadd.f32 %v210_v3, %v50_v4  ;;  %v71_v9 = vadd.f32 %v210_v3, %v51_v7  ;;  %v72_v12 = vadd.f32 %v210_v3, %v52_v11  ;;  %v73_v16 = vadd.f32 %v210_v3, %v53_v14 }
   0x7   :  { %v74_v19 = vadd.f32 %v210_v3, %v54_v18  ;;  %v75_v23 = vadd.f32 %v210_v3, %v55_v21  ;;  %v76_v26 = vadd.f32 %v210_v3, %v56_v25  ;;  %v77_v30 = vadd.f32 %v210_v3, %v57_v28 }
   0x8   :  { %86 = vxpose.xlu0.b32.start [1/16] %v70_v6, 128  ;;  %v156_v31 = vunpack.c.l.bf16 %v173_v29  ;;  %v157_v34 = vunpack.c.h.bf16 %v173_v29  ;;  %v160_v38 = vunpack.c.l.bf16 %v174_v36  ;;  %v161_v41 = vunpack.c.h.bf16 %v174_v36 }
   0x9   :  { %v164_v45 = vunpack.c.l.bf16 %v175_v43  ;;  %v165_v48 = vunpack.c.h.bf16 %v175_v43  ;;  %v168_v52 = vunpack.c.l.bf16 %v176_v50  ;;  %v169_v55 = vunpack.c.h.bf16 %v176_v50 }
   0xa   :  { %v58_v32 = vmul.f32 %v205_v1, %v156_v31  ;;  %v59_v35 = vmul.f32 %v205_v1, %v157_v34  ;;  %v60_v39 = vmul.f32 %v205_v1, %v160_v38  ;;  %v61_v42 = vmul.f32 %v205_v1, %v161_v41 }
   0xb   :  { %v62_v46 = vmul.f32 %v205_v1, %v164_v45  ;;  %v63_v49 = vmul.f32 %v205_v1, %v165_v48  ;;  %v64_v53 = vmul.f32 %v205_v1, %v168_v52  ;;  %v65_v56 = vmul.f32 %v205_v1, %v169_v55 }
   0xc   :  { %v78_v33 = vadd.f32 %v210_v3, %v58_v32  ;;  %v79_v37 = vadd.f32 %v210_v3, %v59_v35  ;;  %v80_v40 = vadd.f32 %v210_v3, %v60_v39  ;;  %v81_v44 = vadd.f32 %v210_v3, %v61_v42 }
   0xd   :  { %v82_v47 = vadd.f32 %v210_v3, %v62_v46  ;;  %v83_v51 = vadd.f32 %v210_v3, %v63_v49  ;;  %v84_v54 = vadd.f32 %v210_v3, %v64_v53  ;;  %v85_v57 = vadd.f32 %v210_v3, %v65_v56 }
  0x10   :  { %87 = vxpose.xlu0.b32.cont [2/16] %v71_v9, 128 }
  0x18   :  { %88 = vxpose.xlu0.b32.cont [3/16] %v72_v12, 128 }
  0x20   :  { %89 = vxpose.xlu0.b32.cont [4/16] %v73_v16, 128 }
  0x28   :  { %90 = vxpose.xlu0.b32.cont [5/16] %v74_v19, 128 }
  0x30   :  { %91 = vxpose.xlu0.b32.cont [6/16] %v75_v23, 128 }
  0x38   :  { %92 = vxpose.xlu0.b32.cont [7/16] %v76_v26, 128 }
  0x40   :  { %93 = vxpose.xlu0.b32.cont [8/16] %v77_v30, 128 }
  0x48   :  { %94 = vxpose.xlu0.b32.cont [9/16] %v78_v33, 128 }
  0x50   :  { %95 = vxpose.xlu0.b32.cont [10/16] %v79_v37, 128 }
  0x58   :  { %96 = vxpose.xlu0.b32.cont [11/16] %v80_v40, 128 }
  0x60   :  { %97 = vxpose.xlu0.b32.cont [12/16] %v81_v44, 128 }
  0x68   :  { %98 = vxpose.xlu0.b32.cont [13/16] %v82_v47, 128 }
  0x70   :  { %99 = vxpose.xlu0.b32.cont [14/16] %v83_v51, 128 }
  0x78   :  { %100 = vxpose.xlu0.b32.cont [15/16] %v84_v54, 128 }
  0x80   :  { %101 = vxpose.xlu0.b32.end [16/16] %v85_v57, 128 }
  0xac   :  { %v102_v58 = vpop.trf.xlu0 }
  0xad   :  { %118 = vst [vmem:[%s316_s3] sm:$0xff] %v102_v58 }
  0xb4   :  { %v103_v59 = vpop.trf.xlu0 }
  0xb5   :  { %119 = vst [vmem:[%s316_s3 + $0x8] sm:$0xff] %v103_v59 }
  0xbc   :  { %v104_v60 = vpop.trf.xlu0 }
  0xbd   :  { %120 = vst [vmem:[%s316_s3 + $0x10] sm:$0xff] %v104_v60 }
  0xc4   :  { %v105_v61 = vpop.trf.xlu0 }
  0xc5   :  { %121 = vst [vmem:[%s316_s3 + $0x18] sm:$0xff] %v105_v61 }
  0xcc   :  { %v106_v62 = vpop.trf.xlu0 }
  0xcd   :  { %122 = vst [vmem:[%s316_s3 + $0x20] sm:$0xff] %v106_v62 }
  0xd4   :  { %v107_v63 = vpop.trf.xlu0 }
  0xd5   :  { %123 = vst [vmem:[%s316_s3 + $0x28] sm:$0xff] %v107_v63 }
  0xdc   :  { %v108_v0 = vpop.trf.xlu0 }
  0xdd   :  { %124 = vst [vmem:[%s316_s3 + $0x30] sm:$0xff] %v108_v0 }
  0xe4   :  { %v109_v1 = vpop.trf.xlu0 }
  0xe5   :  { %125 = vst [vmem:[%s316_s3 + $0x38] sm:$0xff] %v109_v1 }
  0xec   :  { %v110_v2 = vpop.trf.xlu0 }
  0xed   :  { %126 = vst [vmem:[%s316_s3 + $0x40] sm:$0xff] %v110_v2 }
  0xf4   :  { %v111_v3 = vpop.trf.xlu0 }
  0xf5   :  { %127 = vst [vmem:[%s316_s3 + $0x48] sm:$0xff] %v111_v3 }
  0xfc   :  { %v112_v4 = vpop.trf.xlu0 }
  0xfd   :  { %128 = vst [vmem:[%s316_s3 + $0x50] sm:$0xff] %v112_v4 }
 0x104   :  { %v113_v5 = vpop.trf.xlu0 }
 0x105   :  { %129 = vst [vmem:[%s316_s3 + $0x58] sm:$0xff] %v113_v5 }
 0x10c   :  { %v114_v6 = vpop.trf.xlu0 }
 0x10d   :  { %130 = vst [vmem:[%s316_s3 + $0x60] sm:$0xff] %v114_v6 }
 0x114   :  { %v115_v7 = vpop.trf.xlu0 }
 0x115   :  { %131 = vst [vmem:[%s316_s3 + $0x68] sm:$0xff] %v115_v7 }
 0x11c   :  { %v116_v8 = vpop.trf.xlu0 }
 0x11d   :  { %132 = vst [vmem:[%s316_s3 + $0x70] sm:$0xff] %v116_v8 }
 0x124   :  { %v117_v9 = vpop.trf.xlu0 }
 0x125   :  { %133 = vst [vmem:[%s316_s3 + $0x78] sm:$0xff] %v117_v9 }

// kernel: convreg_forward.2
= control target key start
LH: loop header
LB: loop body
LE: loop exit
PB: predicated region body
PF: predicated region fallthrough
CT: control target
= control target key end

     0   :  { %vm390_vm0 = vcmask 1040384   ;;  %s674_s1 = inlined_call_operand.vmem [shape: bf16[128,128], index: 1, kind: input, shape index: {}]   ;;  %s675_s2 = inlined_call_operand.vmem [shape: f32[1,128], index: 2, kind: input, shape index: {}]   ;;  %s676_s0 = inlined_call_operand.vmem [shape: bf16[128,128], index: 0, kind: input, shape index: {}]   ;;  %s677_s3 = inlined_call_operand.vmem [shape: bf16[128,128], index: 3, kind: output, shape index: {0}]   ;;  %s678_s4 = inlined_call_operand.vmem [shape: f32[1,2,128], index: 4, kind: output, shape index: {1}]  }
   0x1   :  { %v480_v0 = vld [vmem:[%s674_s1 + $0x38] sm:$0xff]  ;;  %v479_v1 = vld [vmem:[%s674_s1 + $0x30] sm:$0xff]  ;;  %v478_v2 = vld [vmem:[%s674_s1 + $0x28] sm:$0xff] }
   0x2   :  { %180 = vmatpush.bf16.msra.mxu0 %v480_v0  ;;  %528 = vmatpush.bf16.msra.mxu1 %v480_v0  ;;  %v477_v3 = vld [vmem:[%s674_s1 + $0x20] sm:$0xff]  ;;  %v476_v4 = vld [vmem:[%s674_s1 + $0x18] sm:$0xff]  ;;  %v475_v5 = vld [vmem:[%s674_s1 + $0x10] sm:$0xff] }
   0x3   :  { %529 = vmatpush.bf16.msra.mxu2 %v480_v0  ;;  %530 = vmatpush.bf16.msra.mxu3 %v480_v0  ;;  %v474_v6 = vld [vmem:[%s674_s1 + $0x8] sm:$0xff]  ;;  %v473_v7 = vld [vmem:[%s674_s1] sm:$0xff]  ;;  %v467_v9 = vld [vmem:[%s676_s0 + $0x10] sm:$0xff] }
   0x4   :  { %v465_v8 = vld [vmem:[%s676_s0] sm:$0xff]  ;;  %v471_v11 = vld [vmem:[%s676_s0 + $0x30] sm:$0xff]  ;;  %v466_v12 = vld [vmem:[%s676_s0 + $0x8] sm:$0xff] }
   0x5   :  { %v469_v10 = vld [vmem:[%s676_s0 + $0x20] sm:$0xff]  ;;  %v468_v13 = vld [vmem:[%s676_s0 + $0x18] sm:$0xff]  ;;  %v470_v14 = vld [vmem:[%s676_s0 + $0x28] sm:$0xff] }
   0x6   :  { %181 = vmatpush.bf16.msra.mxu0 %v479_v1  ;;  %531 = vmatpush.bf16.msra.mxu1 %v479_v1  ;;  %v472_v15 = vld [vmem:[%s676_s0 + $0x38] sm:$0xff]  ;;  %v552_v18 = vld [vmem:[%s675_s2] ss:$0 sm:$0xff] }
   0x7   :  { %532 = vmatpush.bf16.msra.mxu2 %v479_v1  ;;  %533 = vmatpush.bf16.msra.mxu3 %v479_v1 }
   0xa   :  { %182 = vmatpush.bf16.msra.mxu0 %v478_v2  ;;  %534 = vmatpush.bf16.msra.mxu1 %v478_v2 }
   0xb   :  { %535 = vmatpush.bf16.msra.mxu2 %v478_v2  ;;  %536 = vmatpush.bf16.msra.mxu3 %v478_v2 }
   0xe   :  { %183 = vmatpush.bf16.msra.mxu0 %v477_v3  ;;  %537 = vmatpush.bf16.msra.mxu1 %v477_v3 }
   0xf   :  { %538 = vmatpush.bf16.msra.mxu2 %v477_v3  ;;  %539 = vmatpush.bf16.msra.mxu3 %v477_v3 }
  0x12   :  { %184 = vmatpush.bf16.msra.mxu0 %v476_v4  ;;  %540 = vmatpush.bf16.msra.mxu1 %v476_v4 }
  0x13   :  { %541 = vmatpush.bf16.msra.mxu2 %v476_v4  ;;  %542 = vmatpush.bf16.msra.mxu3 %v476_v4 }
  0x16   :  { %185 = vmatpush.bf16.msra.mxu0 %v475_v5  ;;  %543 = vmatpush.bf16.msra.mxu1 %v475_v5 }
  0x17   :  { %544 = vmatpush.bf16.msra.mxu2 %v475_v5  ;;  %545 = vmatpush.bf16.msra.mxu3 %v475_v5 }
  0x1a   :  { %186 = vmatpush.bf16.msra.mxu0 %v474_v6  ;;  %546 = vmatpush.bf16.msra.mxu1 %v474_v6 }
  0x1b   :  { %547 = vmatpush.bf16.msra.mxu2 %v474_v6  ;;  %548 = vmatpush.bf16.msra.mxu3 %v474_v6 }
  0x1e   :  { %187 = vmatpush.bf16.msra.mxu0 %v473_v7  ;;  %549 = vmatpush.bf16.msra.mxu1 %v473_v7 }
  0x1f   :  { %550 = vmatpush.bf16.msra.mxu2 %v473_v7  ;;  %551 = vmatpush.bf16.msra.mxu3 %v473_v7 }
  0x21   :  { %188 = vmatmul.bf16.vlgmr.msra.gmra.mxu0 %v465_v8  ;;  %198 = vmatmul.bf16.vlgmr.msra.gmra.mxu1 %v467_v9 }
  0x22   :  { %208 = vmatmul.bf16.vlgmr.msra.gmra.mxu2 %v469_v10  ;;  %218 = vmatmul.bf16.vlgmr.msra.gmra.mxu3 %v471_v11 }
  0x31   :  { %193 = vmatmul.bf16.gmra.mxu0 %v466_v12  ;;  %203 = vmatmul.bf16.gmra.mxu1 %v468_v13 }
  0x32   :  { %213 = vmatmul.bf16.gmra.mxu2 %v470_v14  ;;  %223 = vmatmul.bf16.gmra.mxu3 %v472_v15 }
  0x9e   :  { %v189_v16 = vpop.f32.mrf.mxu0  ;;  %v199_v17 = vpop.f32.mrf.mxu1 }
  0x9f   :  { %v288_v19 = vadd.f32 %v552_v18, %v199_v17  ;;  %v284_v24 = vadd.f32 %v552_v18, %v189_v16  ;;  %v353_v40 = vmul.f32 %v189_v16, %v189_v16  ;;  %v357_v56 = vmul.f32 %v199_v17, %v199_v17 }
  0xa5   :  { %v629_v20 = vpop.f32.mrf.mxu2  ;;  %v631_v21 = vpop.f32.mrf.mxu3 }
  0xa6   :  { %v191_v22 = vpop.f32.mrf.mxu0  ;;  %v201_v23 = vpop.f32.mrf.mxu1  ;;  %v292_v29 = vadd.f32 %v552_v18, %v629_v20  ;;  %v296_v30 = vadd.f32 %v552_v18, %v631_v21  ;;  %v361_v14 = vmul.f32 %v629_v20, %v629_v20 }
  0xa7   :  { %v285_v25 = vadd.f32 %v552_v18, %v191_v22  ;;  %v289_v26 = vadd.f32 %v552_v18, %v201_v23  ;;  %v354_v37 = vmul.f32 %v191_v22, %v191_v22  ;;  %v332_v42 = vadd.f32 %v191_v22, %v189_v16 }
  0xa8   :  { %v358_v61 = vmul.f32 %v201_v23, %v201_v23 }
  0xa9   :  { %v484_v27 = vpack.c.bf16 %v285_v25, %v284_v24  ;;  %v494_v28 = vpack.c.bf16 %v289_v26, %v288_v19  ;;  %v369_v43 = vadd.f32 %v354_v37, %v353_v40 }
  0xab   :  { %485 = vst [vmem:[%s677_s3] sm:$0xff] %v484_v27  }
  0xac   :  { %522 = vst [vmem:[%s677_s3 + $0x10] sm:$0xff] %v494_v28  }
  0xad   :  { %v211_v31 = vpop.f32.mrf.mxu2  ;;  %v641_v32 = vpop.f32.mrf.mxu3 }
  0xae   :  { %v194_v33 = vpop.f32.mrf.mxu0  ;;  %v204_v34 = vpop.f32.mrf.mxu1  ;;  %v293_v35 = vadd.f32 %v552_v18, %v211_v31  ;;  %v297_v36 = vadd.f32 %v552_v18, %v641_v32 }
  0xaf   :  { %v355_v41 = vmul.f32 %v194_v33, %v194_v33  ;;  %v333_v44 = vadd.f32 %v332_v42, %v194_v33  ;;  %v290_v45 = vadd.f32 %v552_v18, %v204_v34  ;;  %v286_v48 = vadd.f32 %v552_v18, %v194_v33 }
  0xb0   :  { %v504_v38 = vpack.c.bf16 %v293_v35, %v292_v29  ;;  %v514_v39 = vpack.c.bf16 %v297_v36, %v296_v30  ;;  %v359_v2 = vmul.f32 %v204_v34, %v204_v34  ;;  %v366_v30 = vmul.f32 %v641_v32, %v641_v32 }
  0xb1   :  { %v370_v49 = vadd.f32 %v369_v43, %v355_v41 }
  0xb2   :  { %524 = vst [vmem:[%s677_s3 + $0x20] sm:$0xff] %v504_v38  }
  0xb3   :  { %526 = vst [vmem:[%s677_s3 + $0x30] sm:$0xff] %v514_v39  }
  0xb5   :  { %v214_v46 = vpop.f32.mrf.mxu2  ;;  %v224_v47 = vpop.f32.mrf.mxu3 }
  0xb6   :  { %v196_v50 = vpop.f32.mrf.mxu0  ;;  %v206_v51 = vpop.f32.mrf.mxu1  ;;  %v294_v0 = vadd.f32 %v552_v18, %v214_v46  ;;  %v298_v1 = vadd.f32 %v552_v18, %v224_v47  ;;  %v367_v35 = vmul.f32 %v224_v47, %v224_v47 }
  0xb7   :  { %v287_v52 = vadd.f32 %v552_v18, %v196_v50  ;;  %v334_v53 = vadd.f32 %v333_v44, %v196_v50  ;;  %v356_v54 = vmul.f32 %v196_v50, %v196_v50  ;;  %v291_v55 = vadd.f32 %v552_v18, %v206_v51 }
  0xb8   :  { %v360_v10 = vmul.f32 %v206_v51, %v206_v51 }
  0xb9   :  { %v489_v57 = vpack.c.bf16 %v287_v52, %v286_v48  ;;  %v335_v58 = vadd.f32 %v334_v53, %v199_v17  ;;  %v371_v59 = vadd.f32 %v370_v49, %v356_v54  ;;  %v499_v60 = vpack.c.bf16 %v291_v55, %v290_v45 }
  0xba   :  { %v362_v17 = vmul.f32 %v211_v31, %v211_v31 }
  0xbb   :  { %521 = vst [vmem:[%s677_s3 + $0x8] sm:$0xff] %v489_v57   ;;  %v372_v62 = vadd.f32 %v371_v59, %v357_v56  ;;  %v336_v63 = vadd.f32 %v335_v58, %v201_v23  ;;  %v363_v23 = vmul.f32 %v214_v46, %v214_v46 }
  0xbc   :  { %523 = vst [vmem:[%s677_s3 + $0x18] sm:$0xff] %v499_v60  }
  0xbd   :  { %v337_v3 = vadd.f32 %v336_v63, %v204_v34  ;;  %v373_v4 = vadd.f32 %v372_v62, %v358_v61  ;;  %v216_v5 = vpop.f32.mrf.mxu2  ;;  %v226_v6 = vpop.f32.mrf.mxu3 }
  0xbe   :  { %v295_v7 = vadd.f32 %v552_v18, %v216_v5  ;;  %v299_v8 = vadd.f32 %v552_v18, %v226_v6  ;;  %v364_v27 = vmul.f32 %v216_v5, %v216_v5  ;;  %v368_v39 = vmul.f32 %v226_v6, %v226_v6 }
  0xbf   :  { %v338_v9 = vadd.f32 %v337_v3, %v206_v51  ;;  %v374_v11 = vadd.f32 %v373_v4, %v359_v2 }
  0xc0   :  { %v509_v12 = vpack.c.bf16 %v295_v7, %v294_v0  ;;  %v519_v13 = vpack.c.bf16 %v299_v8, %v298_v1 }
  0xc1   :  { %v339_v15 = vadd.f32 %v338_v9, %v629_v20  ;;  %v375_v16 = vadd.f32 %v374_v11, %v360_v10  ;;  %v365_v20 = vmul.f32 %v631_v21, %v631_v21 }
  0xc2   :  { %525 = vst [vmem:[%s677_s3 + $0x28] sm:$0xff] %v509_v12  }
  0xc3   :  { %v376_v19 = vadd.f32 %v375_v16, %v361_v14  ;;  %v340_v22 = vadd.f32 %v339_v15, %v211_v31  ;;  %527 = vst [vmem:[%s677_s3 + $0x38] sm:$0xff] %v519_v13  }
  0xc5   :  { %v341_v18 = vadd.f32 %v340_v22, %v214_v46  ;;  %v377_v24 = vadd.f32 %v376_v19, %v362_v17 }
  0xc7   :  { %v378_v25 = vadd.f32 %v377_v24, %v363_v23  ;;  %v342_v26 = vadd.f32 %v341_v18, %v216_v5 }
  0xc9   :  { %v343_v28 = vadd.f32 %v342_v26, %v631_v21  ;;  %v379_v29 = vadd.f32 %v378_v25, %v364_v27 }
  0xcb   :  { %v380_v31 = vadd.f32 %v379_v29, %v365_v20  ;;  %v344_v33 = vadd.f32 %v343_v28, %v641_v32 }
  0xcd   :  { %v345_v34 = vadd.f32 %v344_v33, %v224_v47  ;;  %v381_v36 = vadd.f32 %v380_v31, %v366_v30 }
  0xcf   :  { %v382_v37 = vadd.f32 %v381_v36, %v367_v35  ;;  %v346_v38 = vadd.f32 %v345_v34, %v226_v6 }
  0xd1   :  { %v347_v40 = vrot.slane %v346_v38, 4  ;;  %v383_v41 = vadd.f32 %v382_v37, %v368_v39 }
  0xd3   :  { %v348_v42 = vadd.f32 %v347_v40, %v346_v38  ;;  %v384_v43 = vrot.slane %v383_v41, 4 }
  0xd5   :  { %v349_v44 = vrot.slane %v348_v42, 2  ;;  %v385_v45 = vadd.f32 %v384_v43, %v383_v41 }
  0xd7   :  { %v350_v21 = vadd.f32 %v349_v44, %v348_v42  ;;  %v386_v46 = vrot.slane %v385_v45, 2 }
  0xd9   :  { %v351_v48 = vrot.slane %v350_v21, 1  ;;  %v387_v49 = vadd.f32 %v386_v46, %v385_v45 }
  0xdb   :  { %v388_v50 = vrot.slane %v387_v49, 1  ;;  %v352_v51 = vadd.f32 %v351_v48, %v350_v21 }
  0xdd   :  { %v389_v32 = vadd.f32 %v388_v50, %v387_v49 }
  0xdf   :  { %v391_v52 = vsel %vm390_vm0, %v352_v51, %v389_v32 }
  0xe0   :  { %392 = vst [vmem:[%s678_s4] sm:$0x3] %v391_v52 }

</bundles_post_ra>
